<compile_context>
chip_gen: v5e
topology: v5e:2x2
jax: 0.10.0
libtpu: 0.0.40
codegen_flags: <defaults>
</compile_context>

<pallas_src>
import jax
import jax.numpy as jnp
from jax.experimental import pallas as pl
from jax.experimental.pallas import tpu as pltpu

IN_DIM = 2048
HID = 128
LEAKY_SLOPE = 0.2


def _round_up(x, m):
    return (x + m - 1) // m * m


def _exp_mapper_kernel(x_ref, w1_ref, b1_ref, w2_ref, b2_ref, o_ref):
    # Fused: Linear -> LeakyReLU(0.2) -> Linear, all operands resident in VMEM.
    x = x_ref[...].astype(jnp.bfloat16)                       # in-kernel cast (VPU, hidden under MXU)
    h = jnp.dot(x, w1_ref[...],
                preferred_element_type=jnp.float32)           # (TB, 128)  MXU, f32 acc
    h = h + b1_ref[...]                                       # f32 bias (1, 128)
    h = jnp.where(h > 0, h, LEAKY_SLOPE * h)                  # LeakyReLU(0.2) on VPU (f32)
    h = h.astype(jnp.bfloat16)                                # bf16 for second MXU pass
    o = jnp.dot(h, w2_ref[...],
                preferred_element_type=jnp.float32)           # (TB, N_pad) MXU, f32 acc
    o = o + b2_ref[...]                                       # f32 bias (1, N_pad)
    o_ref[...] = o.astype(o_ref.dtype)


def exp_mapper(emo_feature, w1, b1, w2, b2):
    """emo_feature: (B, 2048) -> (B, dim_exp) f32.

    Weights are (in_features, out_features) (transpose of PyTorch's (out, in)).
    x is passed untouched (no pad / cast copies); weights are bf16, biases f32.
    """
    B = emo_feature.shape[0]
    dim_exp = w2.shape[1]

    # --- lane-dense output: pad dim_exp up to a 128 multiple (weights only) ---
    N_pad = _round_up(dim_exp, 128)

    w1_bf = w1.astype(jnp.bfloat16)                                   # (2048, 128)
    w2_bf = jnp.zeros((HID, N_pad), jnp.bfloat16).at[:, :dim_exp].set(
        w2.astype(jnp.bfloat16))                                      # (128, N_pad)
    b1_f = b1.astype(jnp.float32).reshape(1, HID)
    b2_f = jnp.zeros((1, N_pad), jnp.float32).at[0, :dim_exp].set(
        b2.astype(jnp.float32))

    # --- batch tiling: no padding of B; ragged last tile is masked by Pallas ---
    cap = 512
    if B < 16:
        TB = B                                       # single full-batch block (always legal)
    else:
        # >= 2 tiles so "parallel" can shard across v7x's two TensorCores,
        # rounded to 16 sublanes (bf16 packing), capped at 512 rows.
        TB = min(cap, _round_up(pl.cdiv(B, 2), 16))
    grid = (pl.cdiv(B, TB),)

    itemsize = jnp.dtype(emo_feature.dtype).itemsize
    flops = 2 * B * (IN_DIM * HID + HID * N_pad)
    bytes_accessed = (emo_feature.size * itemsize + w1_bf.size * 2 + w2_bf.size * 2
                      + b1_f.size * 4 + b2_f.size * 4 + B * N_pad * 4)

    out = pl.pallas_call(
        _exp_mapper_kernel,
        out_shape=jax.ShapeDtypeStruct((B, N_pad), jnp.float32),
        grid_spec=pltpu.PrefetchScalarGridSpec(
            num_scalar_prefetch=0,
            grid=grid,
            in_specs=[
                pl.BlockSpec((TB, IN_DIM), lambda i: (i, 0)),   # x tile (pipelined)
                pl.BlockSpec((IN_DIM, HID), lambda i: (0, 0)),  # W1 resident
                pl.BlockSpec((1, HID), lambda i: (0, 0)),       # b1 resident
                pl.BlockSpec((HID, N_pad), lambda i: (0, 0)),   # W2 resident
                pl.BlockSpec((1, N_pad), lambda i: (0, 0)),     # b2 resident
            ],
            out_specs=pl.BlockSpec((TB, N_pad), lambda i: (i, 0)),
        ),
        compiler_params=pltpu.CompilerParams(
            dimension_semantics=("parallel",),                  # v7x: shard B over 2 TCs
        ),
        cost_estimate=pl.CostEstimate(
            flops=flops, bytes_accessed=bytes_accessed, transcendentals=0),
    )(emo_feature, w1_bf, b1_f, w2_bf, b2_f)

    return out if N_pad == dim_exp else out[:, :dim_exp]


def reference(emo_feature, w1, b1, w2, b2):
    # Mirrors the kernel's bf16 inputs / f32 accumulation for a fair comparison.
    x = emo_feature.astype(jnp.bfloat16)
    h = jnp.dot(x, w1.astype(jnp.bfloat16),
                preferred_element_type=jnp.float32) + b1.astype(jnp.float32)
    h = jnp.where(h > 0, h, LEAKY_SLOPE * h)
    h = h.astype(jnp.bfloat16)
    return (jnp.dot(h, w2.astype(jnp.bfloat16),
                    preferred_element_type=jnp.float32)
            + b2.astype(jnp.float32))


if __name__ == "__main__":
    B, DIM_EXP = 2, 64

    key = jax.random.PRNGKey(0)
    k_x, k_w1, k_b1, k_w2, k_b2 = jax.random.split(key, 5)

    # Deterministic synthetic parameters (Kaiming-ish scaling).
    emo_feature = jax.random.normal(k_x, (B, IN_DIM), dtype=jnp.float32)
    w1 = jax.random.normal(k_w1, (IN_DIM, HID), dtype=jnp.float32) * (1.0 / jnp.sqrt(IN_DIM))
    b1 = jax.random.normal(k_b1, (HID,), dtype=jnp.float32) * 0.01
    w2 = jax.random.normal(k_w2, (HID, DIM_EXP), dtype=jnp.float32) * (1.0 / jnp.sqrt(HID))
    b2 = jax.random.normal(k_b2, (DIM_EXP,), dtype=jnp.float32) * 0.01

    out = exp_mapper(emo_feature, w1, b1, w2, b2)
    out = jax.block_until_ready(out)

    ref = reference(emo_feature, w1, b1, w2, b2)
    assert out.shape == (B, DIM_EXP), out.shape
    # bf16 inputs / f32 accumulation on both sides -> results should be very close.
    assert jnp.allclose(out, ref, atol=2e-2, rtol=2e-2), float(jnp.max(jnp.abs(out - ref)))

    print("KERNEL_OK")
</pallas_src>

<mosaic_0001>
module attributes {stable_mosaic.version = 11 : i64} {
  func.func @_exp_mapper_kernel(%arg0: i32, %arg1: memref<2x2048xf32, #tpu.memory_space<vmem>>, %arg2: memref<2048x128xbf16, #tpu.memory_space<vmem>>, %arg3: memref<1x128xf32, #tpu.memory_space<vmem>>, %arg4: memref<128x128xbf16, #tpu.memory_space<vmem>>, %arg5: memref<1x128xf32, #tpu.memory_space<vmem>>, %arg6: memref<2x128xf32, #tpu.memory_space<vmem>>) attributes {dimension_semantics = [#tpu.dimension_semantics<parallel>], iteration_bounds = array<i64: 1>, scalar_prefetch = 0 : i64, scratch_operands = 0 : i64, tpu.core_type = #tpu.core_type<tc>, window_params = [{transform_indices = @transform_0, window_bounds = array<i64: 2, 2048>}, {pipeline_mode = #tpu.pipeline_mode<synchronous>, transform_indices = @transform_1, window_bounds = array<i64: 2048, 128>}, {pipeline_mode = #tpu.pipeline_mode<synchronous>, transform_indices = @transform_2, window_bounds = array<i64: 1, 128>}, {pipeline_mode = #tpu.pipeline_mode<synchronous>, transform_indices = @transform_3, window_bounds = array<i64: 128, 128>}, {pipeline_mode = #tpu.pipeline_mode<synchronous>, transform_indices = @transform_4, window_bounds = array<i64: 1, 128>}, {transform_indices = @transform_5, window_bounds = array<i64: 2, 128>}]} {
    %c0 = arith.constant 0 : index
    %c0_0 = arith.constant 0 : index
    %0 = vector.load %arg1[%c0, %c0_0] : memref<2x2048xf32, #tpu.memory_space<vmem>>, vector<2x2048xf32>
    %1 = arith.truncf %0 : vector<2x2048xf32> to vector<2x2048xbf16>
    %c0_1 = arith.constant 0 : index
    %c0_2 = arith.constant 0 : index
    %2 = vector.load %arg2[%c0_1, %c0_2] : memref<2048x128xbf16, #tpu.memory_space<vmem>>, vector<2048x128xbf16>
    %cst = arith.constant dense<0.000000e+00> : vector<2x128xf32>
    %3 = tpu.matmul %1, %2, %cst {dimension_numbers = #tpu.dot_dimension_numbers<[1], [0], [0], [1], [0, 0, 1, 1], [], []>} : vector<2x2048xbf16>, vector<2048x128xbf16>, vector<2x128xf32> -> vector<2x128xf32>
    %c0_3 = arith.constant 0 : index
    %c0_4 = arith.constant 0 : index
    %4 = vector.load %arg3[%c0_3, %c0_4] : memref<1x128xf32, #tpu.memory_space<vmem>>, vector<1x128xf32>
    %5 = vector.broadcast %4 : vector<1x128xf32> to vector<2x128xf32>
    %6 = arith.addf %3, %5 : vector<2x128xf32>
    %cst_5 = arith.constant 0.000000e+00 : f32
    %7 = vector.broadcast %cst_5 : f32 to vector<2x128xf32>
    %8 = arith.cmpf ogt, %6, %7 : vector<2x128xf32>
    %cst_6 = arith.constant 2.000000e-01 : f32
    %9 = vector.broadcast %cst_6 : f32 to vector<2x128xf32>
    %10 = arith.mulf %9, %6 : vector<2x128xf32>
    %11 = arith.select %8, %6, %10 : vector<2x128xi1>, vector<2x128xf32>
    %12 = arith.truncf %11 : vector<2x128xf32> to vector<2x128xbf16>
    %c0_7 = arith.constant 0 : index
    %c0_8 = arith.constant 0 : index
    %13 = vector.load %arg4[%c0_7, %c0_8] : memref<128x128xbf16, #tpu.memory_space<vmem>>, vector<128x128xbf16>
    %cst_9 = arith.constant dense<0.000000e+00> : vector<2x128xf32>
    %14 = tpu.matmul %12, %13, %cst_9 {dimension_numbers = #tpu.dot_dimension_numbers<[1], [0], [0], [1], [0, 0, 1, 1], [], []>} : vector<2x128xbf16>, vector<128x128xbf16>, vector<2x128xf32> -> vector<2x128xf32>
    %c0_10 = arith.constant 0 : index
    %c0_11 = arith.constant 0 : index
    %15 = vector.load %arg5[%c0_10, %c0_11] : memref<1x128xf32, #tpu.memory_space<vmem>>, vector<1x128xf32>
    %16 = vector.broadcast %15 : vector<1x128xf32> to vector<2x128xf32>
    %17 = arith.addf %14, %16 : vector<2x128xf32>
    %c0_12 = arith.constant 0 : index
    %c0_13 = arith.constant 0 : index
    %18 = vector.load %arg6[%c0_12, %c0_13] : memref<2x128xf32, #tpu.memory_space<vmem>>, vector<2x128xf32>
    tpu.vector_store %arg6[%c0_12, %c0_13], %17 {strides = array<i32>} : memref<2x128xf32, #tpu.memory_space<vmem>>, vector<2x128xf32>,
    return
  }
  func.func @transform_0(%arg0: i32) -> (i32, i32) {
    %c0_i32 = arith.constant 0 : i32
    %c0_i32_0 = arith.constant 0 : i32
    return %arg0, %c0_i32 : i32, i32
  }
  func.func @transform_1(%arg0: i32) -> (i32, i32) {
    %c0_i32 = arith.constant 0 : i32
    %c0_i32_0 = arith.constant 0 : i32
    %c0_i32_1 = arith.constant 0 : i32
    return %c0_i32, %c0_i32_0 : i32, i32
  }
  func.func @transform_2(%arg0: i32) -> (i32, i32) {
    %c0_i32 = arith.constant 0 : i32
    %c0_i32_0 = arith.constant 0 : i32
    %c0_i32_1 = arith.constant 0 : i32
    return %c0_i32, %c0_i32_0 : i32, i32
  }
  func.func @transform_3(%arg0: i32) -> (i32, i32) {
    %c0_i32 = arith.constant 0 : i32
    %c0_i32_0 = arith.constant 0 : i32
    %c0_i32_1 = arith.constant 0 : i32
    return %c0_i32, %c0_i32_0 : i32, i32
  }
  func.func @transform_4(%arg0: i32) -> (i32, i32) {
    %c0_i32 = arith.constant 0 : i32
    %c0_i32_0 = arith.constant 0 : i32
    %c0_i32_1 = arith.constant 0 : i32
    return %c0_i32, %c0_i32_0 : i32, i32
  }
  func.func @transform_5(%arg0: i32) -> (i32, i32) {
    %c0_i32 = arith.constant 0 : i32
    %c0_i32_0 = arith.constant 0 : i32
    return %arg0, %c0_i32 : i32, i32
  }
}

</mosaic_0001>

<bundles_post_ra>
// kernel: tpu_custom_call.1
= control target key start
LH: loop header
LB: loop body
LE: loop exit
PB: predicated region body
PF: predicated region fallthrough
CT: control target
= control target key end

     0   :  { %10 = vsyncpa [#allocation3], 0  ;;  %s2319_s0 = inlined_call_operand.hbm [shape: f32[2,2048], index: 0, kind: input, shape index: {}]   ;;  %s2320_s1 = inlined_call_operand.hbm [shape: bf16[2048,128], index: 1, kind: input, shape index: {}]   ;;  %s2321_s2 = inlined_call_operand.vmem [shape: f32[1,128], index: 2, kind: input, shape index: {}]   ;;  %s2322_s3 = inlined_call_operand.hbm [shape: bf16[128,128], index: 3, kind: input, shape index: {}]   ;;  %s2323_s4 = inlined_call_operand.vmem [shape: f32[1,128], index: 4, kind: input, shape index: {}]   ;;  %s2324_s5 = inlined_call_operand.hbm [shape: f32[2,128], index: 5, kind: output, shape index: {}]  }
   0x1   :  { %11 = vsyncpa [#allocation6], 0  ;;  %s28_s20 = sshll.u32 %s2320_s1, 4  ;;  %s29_s20 = int_to_ptr.hbm [resolvable:$true] %s28_s20 }
   0x2   :  { %12 = vsyncpa [#allocation4], 0  ;;  %s2257_s21 = smov [#allocation5]   ;;  %s18_s25 = sshll.u32 %s2319_s0, 4  ;;  %s19_s25 = int_to_ptr.hbm [resolvable:$true] %s18_s25 }
   0x3   :  { %s30_s22 = sshll.u32 %s2257_s21, 4  ;;  %s2258_s26 = smov 64   ;;  %s31_s22 = int_to_ptr.vmem [resolvable:$true] %s30_s22 }
   0x4   :  { %s2259_s27 = smov 4   ;;  %s2260_s28 = smov [#allocation2]  }
   0x5   :  { %36 = dma.hbm_to_vmem [thread:$0]  %s29_s20, 16384, %s31_s22, [#allocation6], %s2258_s26, %s2258_s26, %s2259_s27  }
   0x6   :  { %s20_s29 = sshll.u32 %s2260_s28, 4  ;;  %s43_s7 = sshll.u32 %s2322_s3, 4  ;;  %s21_s29 = int_to_ptr.vmem [resolvable:$true] %s20_s29  ;;  %s44_s7 = int_to_ptr.hbm [resolvable:$true] %s43_s7 }
   0x7   :  { %23 = dma.hbm_to_vmem [thread:$0]  %s19_s25, 512, %s21_s29, [#allocation3]  }
   0x8   :  { %s2261_s1 = smov [#allocation7]  }
   0x9   :  { %s45_s8 = sshll.u32 %s2261_s1, 4  ;;  %s46_s8 = int_to_ptr.vmem [resolvable:$true] %s45_s8 }
   0xa   :  { %51 = dma.hbm_to_vmem [thread:$0]  %s44_s7, 1024, %s46_s8, [#allocation6], %s2258_s26, %s2258_s26, %s2259_s27  }
   0xb   :  { %2251 = dma.done.wait [#allocation3], 512  }
   0xc   :  { %2252 = vsyncadd [#allocation3], 4294966784 }
   0xd   :  { %2253 = dma.done.wait [#allocation6], 17408  }
   0xe   :  { %2254 = vsyncadd [#allocation6], 4294949888  ;;  %v2018_v0 = vld [vmem:[#allocation5 + $0x38] sm:$0xff]  ;;  %v2017_v4 = vld [vmem:[#allocation5 + $0x30] sm:$0xff]  ;;  %s2262_s10 = smov [#allocation8]   ;;  %s1456_s14 = sshll.u32 %s2324_s5, 4  ;;  %s1457_s14 = int_to_ptr.hbm [resolvable:$true] %s1456_s14 }
   0xf   :  { %v2026_v1 = vld [vmem:[#allocation5 + $0x78] sm:$0xff]  ;;  %1155 = vmatpush.bf16.msra.mxu0 %v2018_v0  ;;  %v2025_v5 = vld [vmem:[#allocation5 + $0x70] sm:$0xff]  ;;  %v2016_v8 = vld [vmem:[#allocation5 + $0x28] sm:$0xff]  ;;  %s1454_s11 = sshll.u32 %s2262_s10, 4  ;;  %s1455_s11 = int_to_ptr.vmem [resolvable:$true] %s1454_s11 }
  0x10   :  { %v2034_v2 = vld [vmem:[#allocation5 + $0xb8] sm:$0xff]  ;;  %1168 = vmatpush.bf16.msra.mxu1 %v2026_v1  ;;  %v2033_v6 = vld [vmem:[#allocation5 + $0xb0] sm:$0xff]  ;;  %v2024_v9 = vld [vmem:[#allocation5 + $0x68] sm:$0xff] }
  0x11   :  { %v2042_v3 = vld [vmem:[#allocation5 + $0xf8] sm:$0xff]  ;;  %1181 = vmatpush.bf16.msra.mxu2 %v2034_v2  ;;  %v2041_v7 = vld [vmem:[#allocation5 + $0xf0] sm:$0xff]  ;;  %v2032_v10 = vld [vmem:[#allocation5 + $0xa8] sm:$0xff] }
  0x12   :  { %1194 = vmatpush.bf16.msra.mxu3 %v2042_v3  ;;  %v2040_v11 = vld [vmem:[#allocation5 + $0xe8] sm:$0xff]  ;;  %v2015_v12 = vld [vmem:[#allocation5 + $0x20] sm:$0xff]  ;;  %v2014_v16 = vld [vmem:[#allocation5 + $0x18] sm:$0xff] }
  0x13   :  { %1156 = vmatpush.bf16.msra.mxu0 %v2017_v4  ;;  %v2023_v13 = vld [vmem:[#allocation5 + $0x60] sm:$0xff]  ;;  %v2022_v17 = vld [vmem:[#allocation5 + $0x58] sm:$0xff]  ;;  %v2013_v20 = vld [vmem:[#allocation5 + $0x10] sm:$0xff] }
  0x14   :  { %1169 = vmatpush.bf16.msra.mxu1 %v2025_v5  ;;  %v2031_v14 = vld [vmem:[#allocation5 + $0xa0] sm:$0xff]  ;;  %v2030_v18 = vld [vmem:[#allocation5 + $0x98] sm:$0xff]  ;;  %v2021_v21 = vld [vmem:[#allocation5 + $0x50] sm:$0xff] }
  0x15   :  { %1182 = vmatpush.bf16.msra.mxu2 %v2033_v6  ;;  %v2039_v15 = vld [vmem:[#allocation5 + $0xe0] sm:$0xff]  ;;  %v2038_v19 = vld [vmem:[#allocation5 + $0xd8] sm:$0xff]  ;;  %v2029_v23 = vld [vmem:[#allocation5 + $0x90] sm:$0xff] }
  0x16   :  { %1195 = vmatpush.bf16.msra.mxu3 %v2041_v7  ;;  %v66_v22 = vld [vmem:[#allocation2] sm:$0xff]  ;;  %v2037_v24 = vld [vmem:[#allocation5 + $0xd0] sm:$0xff]  ;;  %v2012_v25 = vld [vmem:[#allocation5 + $0x8] sm:$0xff] }
  0x17   :  { %1157 = vmatpush.bf16.msra.mxu0 %v2016_v8  ;;  %74 = vst [vmem:[#allocation1] ss:$4 sm:$0xff] %v66_v22  ;;  %v2020_v26 = vld [vmem:[#allocation5 + $0x48] sm:$0xff]  ;;  %v2011_v29 = vld [vmem:[#allocation5] sm:$0xff]  ;;  %v68_v35 = vld [vmem:[#allocation2 + $0x10] sm:$0xff] }
  0x18   :  { %1170 = vmatpush.bf16.msra.mxu1 %v2024_v9  ;;  %v2028_v27 = vld [vmem:[#allocation5 + $0x88] sm:$0xff]  ;;  %v2019_v30 = vld [vmem:[#allocation5 + $0x40] sm:$0xff]  ;;  %v2050_v38 = vld [vmem:[#allocation5 + $0x138] sm:$0xff] }
  0x19   :  { %1183 = vmatpush.bf16.msra.mxu2 %v2032_v10  ;;  %v2036_v28 = vld [vmem:[#allocation5 + $0xc8] sm:$0xff]  ;;  %v2027_v31 = vld [vmem:[#allocation5 + $0x80] sm:$0xff]  ;;  %v2058_v39 = vld [vmem:[#allocation5 + $0x178] sm:$0xff] }
  0x1a   :  { %1196 = vmatpush.bf16.msra.mxu3 %v2040_v11  ;;  %v2035_v33 = vld [vmem:[#allocation5 + $0xc0] sm:$0xff]  ;;  %v2066_v40 = vld [vmem:[#allocation5 + $0x1b8] sm:$0xff]  ;;  %v67_v42 = vld [vmem:[#allocation2 + $0x8] sm:$0xff] }
  0x1b   :  { %1158 = vmatpush.bf16.msra.mxu0 %v2015_v12  ;;  %v2074_v41 = vld [vmem:[#allocation5 + $0x1f8] sm:$0xff]  ;;  %76 = vst [vmem:[#allocation1 + $0x20] ss:$4 sm:$0xff] %v67_v42  ;;  %v2049_v47 = vld [vmem:[#allocation5 + $0x130] sm:$0xff]  ;;  %v2048_v51 = vld [vmem:[#allocation5 + $0x128] sm:$0xff] }
  0x1c   :  { %1171 = vmatpush.bf16.msra.mxu1 %v2023_v13  ;;  %v2057_v48 = vld [vmem:[#allocation5 + $0x170] sm:$0xff]  ;;  %v2056_v52 = vld [vmem:[#allocation5 + $0x168] sm:$0xff]  ;;  %v2047_v55 = vld [vmem:[#allocation5 + $0x120] sm:$0xff] }
  0x1d   :  { %1184 = vmatpush.bf16.msra.mxu2 %v2031_v14  ;;  %v2065_v49 = vld [vmem:[#allocation5 + $0x1b0] sm:$0xff]  ;;  %v2064_v53 = vld [vmem:[#allocation5 + $0x1a8] sm:$0xff]  ;;  %v2055_v57 = vld [vmem:[#allocation5 + $0x160] sm:$0xff] }
  0x1e   :  { %1197 = vmatpush.bf16.msra.mxu3 %v2039_v15  ;;  %v79_v32 = vld.sshfl [vmem:[#allocation1 + $0x10] sm:$0xff pattern:$0x73625140]  ;;  %v77_v34 = vld.sshfl [vmem:[#allocation1] sm:$0xff pattern:$0x73625140] }
  0x1f   :  { %1159 = vmatpush.bf16.msra.mxu0 %v2014_v16  ;;  %v80_v36 = vld.sshfl [vmem:[#allocation1 + $0x18] sm:$0xff pattern:$0x73625140]  ;;  %v78_v37 = vld.sshfl [vmem:[#allocation1 + $0x8] sm:$0xff pattern:$0x73625140]  ;;  %v113_v43 = vpack.c.bf16 %v79_v32, %v79_v32  ;;  %v111_v44 = vpack.c.bf16 %v77_v34, %v77_v34 }
  0x20   :  { %1172 = vmatpush.bf16.msra.mxu1 %v2022_v17  ;;  %85 = vst [vmem:[#allocation1] ss:$4 sm:$0xff] %v68_v35  ;;  %v114_v45 = vpack.c.bf16 %v80_v36, %v80_v36  ;;  %v112_v46 = vpack.c.bf16 %v78_v37, %v78_v37  ;;  %v2073_v50 = vld [vmem:[#allocation5 + $0x1f0] sm:$0xff]  ;;  %v2072_v54 = vld [vmem:[#allocation5 + $0x1e8] sm:$0xff]  ;;  %v69_v59 = vld [vmem:[#allocation2 + $0x18] sm:$0xff] }
  0x21   :  { %1185 = vmatpush.bf16.msra.mxu2 %v2030_v18  ;;  %v2063_v62 = vld [vmem:[#allocation5 + $0x1a0] sm:$0xff]  ;;  %v2046_v0 = vld [vmem:[#allocation5 + $0x118] sm:$0xff]  ;;  %v2045_v4 = vld [vmem:[#allocation5 + $0x110] sm:$0xff] }
  0x22   :  { %1198 = vmatpush.bf16.msra.mxu3 %v2038_v19  ;;  %v2302_v56 = vld.sshfl [vmem:[#allocation1 + $0x30] sm:$0xff pattern:$0x73625140]  ;;  %v2304_v58 = vld.sshfl [vmem:[#allocation1 + $0x20] sm:$0xff pattern:$0x73625140] }
  0x23   :  { %1160 = vmatpush.bf16.msra.mxu0 %v2013_v20  ;;  %v84_v60 = vld.sshfl [vmem:[#allocation1 + $0x38] sm:$0xff pattern:$0x73625140]  ;;  %v82_v61 = vld.sshfl [vmem:[#allocation1 + $0x28] sm:$0xff pattern:$0x73625140]  ;;  %v117_v20 = vpack.c.bf16 %v2302_v56, %v2302_v56 }
  0x24   :  { %1173 = vmatpush.bf16.msra.mxu1 %v2021_v21  ;;  %v2071_v63 = vld [vmem:[#allocation5 + $0x1e0] sm:$0xff]  ;;  %86 = vst [vmem:[#allocation1 + $0x20] ss:$4 sm:$0xff] %v69_v59  ;;  %v2054_v1 = vld [vmem:[#allocation5 + $0x158] sm:$0xff]  ;;  %v2053_v5 = vld [vmem:[#allocation5 + $0x150] sm:$0xff]  ;;  %v115_v21 = vpack.c.bf16 %v2304_v58, %v2304_v58  ;;  %v118_v22 = vpack.c.bf16 %v84_v60, %v84_v60 }
  0x25   :  { %1186 = vmatpush.bf16.msra.mxu2 %v2029_v23  ;;  %v2062_v2 = vld [vmem:[#allocation5 + $0x198] sm:$0xff]  ;;  %v2061_v6 = vld [vmem:[#allocation5 + $0x190] sm:$0xff]  ;;  %v2044_v8 = vld [vmem:[#allocation5 + $0x108] sm:$0xff]  ;;  %v116_v23 = vpack.c.bf16 %v82_v61, %v82_v61 }
  0x26   :  { %1199 = vmatpush.bf16.msra.mxu3 %v2037_v24  ;;  %v2070_v3 = vld [vmem:[#allocation5 + $0x1d8] sm:$0xff]  ;;  %v2069_v7 = vld [vmem:[#allocation5 + $0x1d0] sm:$0xff]  ;;  %v2052_v9 = vld [vmem:[#allocation5 + $0x148] sm:$0xff] }
  0x27   :  { %1161 = vmatpush.bf16.msra.mxu0 %v2012_v25  ;;  %v2060_v10 = vld [vmem:[#allocation5 + $0x188] sm:$0xff]  ;;  %v2043_v12 = vld [vmem:[#allocation5 + $0x100] sm:$0xff]  ;;  %v2082_v16 = vld [vmem:[#allocation5 + $0x238] sm:$0xff] }
  0x28   :  { %1174 = vmatpush.bf16.msra.mxu1 %v2020_v26  ;;  %v2068_v11 = vld [vmem:[#allocation5 + $0x1c8] sm:$0xff]  ;;  %v2051_v13 = vld [vmem:[#allocation5 + $0x140] sm:$0xff]  ;;  %v2090_v17 = vld [vmem:[#allocation5 + $0x278] sm:$0xff] }
  0x29   :  { %1187 = vmatpush.bf16.msra.mxu2 %v2028_v27  ;;  %v2059_v14 = vld [vmem:[#allocation5 + $0x180] sm:$0xff]  ;;  %v2098_v18 = vld [vmem:[#allocation5 + $0x2b8] sm:$0xff]  ;;  %v2081_v24 = vld [vmem:[#allocation5 + $0x230] sm:$0xff] }
  0x2a   :  { %1200 = vmatpush.bf16.msra.mxu3 %v2036_v28  ;;  %v2067_v15 = vld [vmem:[#allocation5 + $0x1c0] sm:$0xff]  ;;  %v2106_v19 = vld [vmem:[#allocation5 + $0x2f8] sm:$0xff]  ;;  %v2089_v25 = vld [vmem:[#allocation5 + $0x270] sm:$0xff] }
  0x2b   :  { %1162 = vmatpush.bf16.msra.mxu0 %v2011_v29  ;;  %v2097_v26 = vld [vmem:[#allocation5 + $0x2b0] sm:$0xff]  ;;  %v2080_v28 = vld [vmem:[#allocation5 + $0x228] sm:$0xff]  ;;  %v2079_v32 = vld [vmem:[#allocation5 + $0x220] sm:$0xff] }
  0x2c   :  { %1175 = vmatpush.bf16.msra.mxu1 %v2019_v30  ;;  %v2105_v27 = vld [vmem:[#allocation5 + $0x2f0] sm:$0xff]  ;;  %v2088_v29 = vld [vmem:[#allocation5 + $0x268] sm:$0xff]  ;;  %v2095_v34 = vld [vmem:[#allocation5 + $0x2a0] sm:$0xff] }
  0x2d   :  { %1188 = vmatpush.bf16.msra.mxu2 %v2027_v31  ;;  %v2096_v30 = vld [vmem:[#allocation5 + $0x2a8] sm:$0xff]  ;;  %v2103_v35 = vld [vmem:[#allocation5 + $0x2e0] sm:$0xff]  ;;  %v2078_v36 = vld [vmem:[#allocation5 + $0x218] sm:$0xff] }
  0x2e   :  { %1201 = vmatpush.bf16.msra.mxu3 %v2035_v33  ;;  %1163 = vmatmul.bf16.vlgmr.msra.gmra.mxu0 %v111_v44  ;;  %v2104_v31 = vld [vmem:[#allocation5 + $0x2e8] sm:$0xff]  ;;  %v2087_v33 = vld [vmem:[#allocation5 + $0x260] sm:$0xff]  ;;  %v2086_v37 = vld [vmem:[#allocation5 + $0x258] sm:$0xff] }
  0x2f   :  { %1207 = vmatpush.bf16.msrb.mxu0 %v2050_v38  ;;  %1176 = vmatmul.bf16.vlgmr.msra.gmra.mxu1 %v112_v46  ;;  %v2094_v38 = vld [vmem:[#allocation5 + $0x298] sm:$0xff]  ;;  %v2093_v42 = vld [vmem:[#allocation5 + $0x290] sm:$0xff]  ;;  %v2076_v44 = vld [vmem:[#allocation5 + $0x208] sm:$0xff] }
  0x30   :  { %1220 = vmatpush.bf16.msrb.mxu1 %v2058_v39  ;;  %1189 = vmatmul.bf16.vlgmr.msra.gmra.mxu2 %v113_v43  ;;  %v2102_v39 = vld [vmem:[#allocation5 + $0x2d8] sm:$0xff]  ;;  %v2101_v43 = vld [vmem:[#allocation5 + $0x2d0] sm:$0xff]  ;;  %v2092_v46 = vld [vmem:[#allocation5 + $0x288] sm:$0xff] }
  0x31   :  { %1233 = vmatpush.bf16.msrb.mxu2 %v2066_v40  ;;  %1202 = vmatmul.bf16.vlgmr.msra.gmra.mxu3 %v114_v45  ;;  %v2077_v40 = vld [vmem:[#allocation5 + $0x210] sm:$0xff]  ;;  %v2084_v45 = vld [vmem:[#allocation5 + $0x248] sm:$0xff]  ;;  %v88_v56 = vld.sshfl [vmem:[#allocation1 + $0x8] sm:$0xff pattern:$0x73625140] }
  0x32   :  { %1246 = vmatpush.bf16.msrb.mxu3 %v2074_v41  ;;  %v2085_v41 = vld [vmem:[#allocation5 + $0x250] sm:$0xff]  ;;  %v2130_v58 = vld [vmem:[#allocation5 + $0x3b8] sm:$0xff] }
  0x33   :  { %1208 = vmatpush.bf16.msrb.mxu0 %v2049_v47  ;;  %v2100_v47 = vld [vmem:[#allocation5 + $0x2c8] sm:$0xff]  ;;  %v2138_v59 = vld [vmem:[#allocation5 + $0x3f8] sm:$0xff] }
  0x34   :  { %1221 = vmatpush.bf16.msrb.mxu1 %v2057_v48  ;;  %v2075_v48 = vld [vmem:[#allocation5 + $0x200] sm:$0xff] }
  0x35   :  { %1234 = vmatpush.bf16.msrb.mxu2 %v2065_v49  ;;  %v2083_v49 = vld [vmem:[#allocation5 + $0x240] sm:$0xff] }
  0x36   :  { %1247 = vmatpush.bf16.msrb.mxu3 %v2073_v50  ;;  %v2091_v50 = vld [vmem:[#allocation5 + $0x280] sm:$0xff] }
  0x37   :  { %1209 = vmatpush.bf16.msrb.mxu0 %v2048_v51  ;;  %v2099_v51 = vld [vmem:[#allocation5 + $0x2c0] sm:$0xff] }
  0x38   :  { %1222 = vmatpush.bf16.msrb.mxu1 %v2056_v52  ;;  %v2114_v52 = vld [vmem:[#allocation5 + $0x338] sm:$0xff] }
  0x39   :  { %1235 = vmatpush.bf16.msrb.mxu2 %v2064_v53  ;;  %v2122_v53 = vld [vmem:[#allocation5 + $0x378] sm:$0xff] }
  0x3a   :  { %1248 = vmatpush.bf16.msrb.mxu3 %v2072_v54  ;;  %v87_v54 = vld.sshfl [vmem:[#allocation1] sm:$0xff pattern:$0x73625140] }
  0x3b   :  { %1210 = vmatpush.bf16.msrb.mxu0 %v2047_v55  ;;  %v89_v55 = vld.sshfl [vmem:[#allocation1 + $0x10] sm:$0xff pattern:$0x73625140]  ;;  %v119_v60 = vpack.c.bf16 %v87_v54, %v87_v54 }
  0x3c   :  { %1223 = vmatpush.bf16.msrb.mxu1 %v2055_v57  ;;  %v90_v57 = vld.sshfl [vmem:[#allocation1 + $0x18] sm:$0xff pattern:$0x73625140]  ;;  %v121_v61 = vpack.c.bf16 %v89_v55, %v89_v55 }
  0x3d   :  { %1236 = vmatpush.bf16.msrb.mxu2 %v2063_v62  ;;  %v120_v62 = vpack.c.bf16 %v88_v56, %v88_v56  ;;  %v2145_v56 = vld [vmem:[#allocation7 + $0x30] sm:$0xff] }
  0x3e   :  { %1249 = vmatpush.bf16.msrb.mxu3 %v2071_v63  ;;  %v122_v63 = vpack.c.bf16 %v90_v57, %v90_v57  ;;  %v2144_v57 = vld [vmem:[#allocation7 + $0x28] sm:$0xff] }
  0x3f   :  { %1211 = vmatpush.bf16.msrb.mxu0 %v2046_v0  ;;  %v2113_v0 = vld [vmem:[#allocation5 + $0x330] sm:$0xff] }
  0x40   :  { %1224 = vmatpush.bf16.msrb.mxu1 %v2054_v1  ;;  %v2121_v1 = vld [vmem:[#allocation5 + $0x370] sm:$0xff] }
  0x41   :  { %1237 = vmatpush.bf16.msrb.mxu2 %v2062_v2  ;;  %v2129_v2 = vld [vmem:[#allocation5 + $0x3b0] sm:$0xff] }
  0x42   :  { %1250 = vmatpush.bf16.msrb.mxu3 %v2070_v3  ;;  %v2137_v3 = vld [vmem:[#allocation5 + $0x3f0] sm:$0xff] }
  0x43   :  { %1212 = vmatpush.bf16.msrb.mxu0 %v2045_v4  ;;  %v2112_v4 = vld [vmem:[#allocation5 + $0x328] sm:$0xff] }
  0x44   :  { %1225 = vmatpush.bf16.msrb.mxu1 %v2053_v5  ;;  %v2120_v5 = vld [vmem:[#allocation5 + $0x368] sm:$0xff] }
  0x45   :  { %1238 = vmatpush.bf16.msrb.mxu2 %v2061_v6  ;;  %v2128_v6 = vld [vmem:[#allocation5 + $0x3a8] sm:$0xff] }
  0x46   :  { %1251 = vmatpush.bf16.msrb.mxu3 %v2069_v7  ;;  %v2136_v7 = vld [vmem:[#allocation5 + $0x3e8] sm:$0xff] }
  0x47   :  { %1213 = vmatpush.bf16.msrb.mxu0 %v2044_v8  ;;  %v2111_v8 = vld [vmem:[#allocation5 + $0x320] sm:$0xff] }
  0x48   :  { %1226 = vmatpush.bf16.msrb.mxu1 %v2052_v9  ;;  %v2119_v9 = vld [vmem:[#allocation5 + $0x360] sm:$0xff] }
  0x49   :  { %1239 = vmatpush.bf16.msrb.mxu2 %v2060_v10  ;;  %v2127_v10 = vld [vmem:[#allocation5 + $0x3a0] sm:$0xff] }
  0x4a   :  { %1252 = vmatpush.bf16.msrb.mxu3 %v2068_v11  ;;  %v2135_v11 = vld [vmem:[#allocation5 + $0x3e0] sm:$0xff] }
  0x4b   :  { %1214 = vmatpush.bf16.msrb.mxu0 %v2043_v12  ;;  %v2110_v12 = vld [vmem:[#allocation5 + $0x318] sm:$0xff] }
  0x4c   :  { %1227 = vmatpush.bf16.msrb.mxu1 %v2051_v13  ;;  %v2118_v13 = vld [vmem:[#allocation5 + $0x358] sm:$0xff] }
  0x4d   :  { %1240 = vmatpush.bf16.msrb.mxu2 %v2059_v14  ;;  %v2126_v14 = vld [vmem:[#allocation5 + $0x398] sm:$0xff] }
  0x4e   :  { %1253 = vmatpush.bf16.msrb.mxu3 %v2067_v15  ;;  %1215 = vmatmul.bf16.vlgmr.msrb.gmra.mxu0 %v115_v21  ;;  %v2134_v15 = vld [vmem:[#allocation5 + $0x3d8] sm:$0xff]  ;;  %v2116_v21 = vld [vmem:[#allocation5 + $0x348] sm:$0xff] }
  0x4f   :  { %1259 = vmatpush.bf16.msra.mxu0 %v2082_v16  ;;  %1228 = vmatmul.bf16.vlgmr.msrb.gmra.mxu1 %v116_v23  ;;  %v2109_v16 = vld [vmem:[#allocation5 + $0x310] sm:$0xff]  ;;  %v2132_v23 = vld [vmem:[#allocation5 + $0x3c8] sm:$0xff] }
  0x50   :  { %1272 = vmatpush.bf16.msra.mxu1 %v2090_v17  ;;  %1241 = vmatmul.bf16.vlgmr.msrb.gmra.mxu2 %v117_v20  ;;  %v2117_v17 = vld [vmem:[#allocation5 + $0x350] sm:$0xff]  ;;  %v2108_v20 = vld [vmem:[#allocation5 + $0x308] sm:$0xff] }
  0x51   :  { %1285 = vmatpush.bf16.msra.mxu2 %v2098_v18  ;;  %1254 = vmatmul.bf16.vlgmr.msrb.gmra.mxu3 %v118_v22  ;;  %v2125_v18 = vld [vmem:[#allocation5 + $0x390] sm:$0xff]  ;;  %v2124_v22 = vld [vmem:[#allocation5 + $0x388] sm:$0xff] }
  0x52   :  { %1298 = vmatpush.bf16.msra.mxu3 %v2106_v19  ;;  %v2133_v19 = vld [vmem:[#allocation5 + $0x3d0] sm:$0xff] }
  0x53   :  { %1260 = vmatpush.bf16.msra.mxu0 %v2081_v24  ;;  %v2107_v24 = vld [vmem:[#allocation5 + $0x300] sm:$0xff] }
  0x54   :  { %1273 = vmatpush.bf16.msra.mxu1 %v2089_v25  ;;  %v2115_v25 = vld [vmem:[#allocation5 + $0x340] sm:$0xff] }
  0x55   :  { %1286 = vmatpush.bf16.msra.mxu2 %v2097_v26  ;;  %v2123_v26 = vld [vmem:[#allocation5 + $0x380] sm:$0xff] }
  0x56   :  { %1299 = vmatpush.bf16.msra.mxu3 %v2105_v27  ;;  %v2131_v27 = vld [vmem:[#allocation5 + $0x3c0] sm:$0xff] }
  0x57   :  { %1261 = vmatpush.bf16.msra.mxu0 %v2080_v28  ;;  %v91_v28 = vld.sshfl [vmem:[#allocation1 + $0x20] sm:$0xff pattern:$0x73625140] }
  0x58   :  { %1274 = vmatpush.bf16.msra.mxu1 %v2088_v29  ;;  %v92_v29 = vld.sshfl [vmem:[#allocation1 + $0x28] sm:$0xff pattern:$0x73625140] }
  0x59   :  { %1287 = vmatpush.bf16.msra.mxu2 %v2096_v30  ;;  %v93_v30 = vld.sshfl [vmem:[#allocation1 + $0x30] sm:$0xff pattern:$0x73625140] }
  0x5a   :  { %1300 = vmatpush.bf16.msra.mxu3 %v2104_v31  ;;  %v94_v31 = vld.sshfl [vmem:[#allocation1 + $0x38] sm:$0xff pattern:$0x73625140] }
  0x5b   :  { %1262 = vmatpush.bf16.msra.mxu0 %v2079_v32  ;;  %v123_v32 = vpack.c.bf16 %v91_v28, %v91_v28 }
  0x5c   :  { %1275 = vmatpush.bf16.msra.mxu1 %v2087_v33  ;;  %v124_v33 = vpack.c.bf16 %v92_v29, %v92_v29 }
  0x5d   :  { %1288 = vmatpush.bf16.msra.mxu2 %v2095_v34  ;;  %v125_v34 = vpack.c.bf16 %v93_v30, %v93_v30 }
  0x5e   :  { %1301 = vmatpush.bf16.msra.mxu3 %v2103_v35  ;;  %v126_v35 = vpack.c.bf16 %v94_v31, %v94_v31 }
  0x5f   :  { %1263 = vmatpush.bf16.msra.mxu0 %v2078_v36  ;;  %v2153_v36 = vld [vmem:[%s2321_s2] ss:$0 sm:$0xff] }
  0x60   :  { %1276 = vmatpush.bf16.msra.mxu1 %v2086_v37 }
  0x61   :  { %1289 = vmatpush.bf16.msra.mxu2 %v2094_v38 }
  0x62   :  { %1302 = vmatpush.bf16.msra.mxu3 %v2102_v39 }
  0x63   :  { %1264 = vmatpush.bf16.msra.mxu0 %v2077_v40 }
  0x64   :  { %1277 = vmatpush.bf16.msra.mxu1 %v2085_v41 }
  0x65   :  { %1290 = vmatpush.bf16.msra.mxu2 %v2093_v42 }
  0x66   :  { %1303 = vmatpush.bf16.msra.mxu3 %v2101_v43 }
  0x67   :  { %1265 = vmatpush.bf16.msra.mxu0 %v2076_v44 }
  0x68   :  { %1278 = vmatpush.bf16.msra.mxu1 %v2084_v45 }
  0x69   :  { %1291 = vmatpush.bf16.msra.mxu2 %v2092_v46 }
  0x6a   :  { %1304 = vmatpush.bf16.msra.mxu3 %v2100_v47 }
  0x6b   :  { %1266 = vmatpush.bf16.msra.mxu0 %v2075_v48 }
  0x6c   :  { %1279 = vmatpush.bf16.msra.mxu1 %v2083_v49 }
  0x6d   :  { %1292 = vmatpush.bf16.msra.mxu2 %v2091_v50 }
  0x6e   :  { %1305 = vmatpush.bf16.msra.mxu3 %v2099_v51  ;;  %1267 = vmatmul.bf16.vlgmr.msra.gmra.mxu0 %v119_v60  ;;  %v2143_v60 = vld [vmem:[#allocation7 + $0x20] sm:$0xff] }
  0x6f   :  { %1311 = vmatpush.bf16.msrb.mxu0 %v2114_v52  ;;  %1280 = vmatmul.bf16.vlgmr.msra.gmra.mxu1 %v120_v62 }
  0x70   :  { %1324 = vmatpush.bf16.msrb.mxu1 %v2122_v53  ;;  %1293 = vmatmul.bf16.vlgmr.msra.gmra.mxu2 %v121_v61  ;;  %v2146_v53 = vld [vmem:[#allocation7 + $0x38] sm:$0xff] }
  0x71   :  { %1337 = vmatpush.bf16.msrb.mxu2 %v2130_v58  ;;  %1306 = vmatmul.bf16.vlgmr.msra.gmra.mxu3 %v122_v63  ;;  %v2142_v61 = vld [vmem:[#allocation7 + $0x18] sm:$0xff]  ;;  %v2141_v63 = vld [vmem:[#allocation7 + $0x10] sm:$0xff] }
  0x72   :  { %1350 = vmatpush.bf16.msrb.mxu3 %v2138_v59 }
  0x73   :  { %1312 = vmatpush.bf16.msrb.mxu0 %v2113_v0 }
  0x74   :  { %1325 = vmatpush.bf16.msrb.mxu1 %v2121_v1 }
  0x75   :  { %1338 = vmatpush.bf16.msrb.mxu2 %v2129_v2  ;;  %v2140_v2 = vld [vmem:[#allocation7 + $0x8] sm:$0xff] }
  0x76   :  { %1351 = vmatpush.bf16.msrb.mxu3 %v2137_v3 }
  0x77   :  { %1313 = vmatpush.bf16.msrb.mxu0 %v2112_v4 }
  0x78   :  { %1326 = vmatpush.bf16.msrb.mxu1 %v2120_v5 }
  0x79   :  { %1339 = vmatpush.bf16.msrb.mxu2 %v2128_v6 }
  0x7a   :  { %1352 = vmatpush.bf16.msrb.mxu3 %v2136_v7 }
  0x7b   :  { %1314 = vmatpush.bf16.msrb.mxu0 %v2111_v8  ;;  %v2139_v8 = vld [vmem:[#allocation7] sm:$0xff] }
  0x7c   :  { %1327 = vmatpush.bf16.msrb.mxu1 %v2119_v9 }
  0x7d   :  { %1340 = vmatpush.bf16.msrb.mxu2 %v2127_v10 }
  0x7e   :  { %1353 = vmatpush.bf16.msrb.mxu3 %v2135_v11 }
  0x7f   :  { %1315 = vmatpush.bf16.msrb.mxu0 %v2110_v12 }
  0x80   :  { %1328 = vmatpush.bf16.msrb.mxu1 %v2118_v13 }
  0x81   :  { %1341 = vmatpush.bf16.msrb.mxu2 %v2126_v14 }
  0x82   :  { %1354 = vmatpush.bf16.msrb.mxu3 %v2134_v15 }
  0x83   :  { %1316 = vmatpush.bf16.msrb.mxu0 %v2109_v16 }
  0x84   :  { %1329 = vmatpush.bf16.msrb.mxu1 %v2117_v17 }
  0x85   :  { %1342 = vmatpush.bf16.msrb.mxu2 %v2125_v18 }
  0x86   :  { %1355 = vmatpush.bf16.msrb.mxu3 %v2133_v19 }
  0x87   :  { %1317 = vmatpush.bf16.msrb.mxu0 %v2108_v20 }
  0x88   :  { %1330 = vmatpush.bf16.msrb.mxu1 %v2116_v21 }
  0x89   :  { %1343 = vmatpush.bf16.msrb.mxu2 %v2124_v22 }
  0x8a   :  { %1356 = vmatpush.bf16.msrb.mxu3 %v2132_v23 }
  0x8b   :  { %1318 = vmatpush.bf16.msrb.mxu0 %v2107_v24 }
  0x8c   :  { %1331 = vmatpush.bf16.msrb.mxu1 %v2115_v25 }
  0x8d   :  { %1344 = vmatpush.bf16.msrb.mxu2 %v2123_v26 }
  0x8e   :  { %1357 = vmatpush.bf16.msrb.mxu3 %v2131_v27  ;;  %1319 = vmatmul.bf16.vlgmr.msrb.gmra.mxu0 %v123_v32  ;;  %v2154_v32 = vld [vmem:[%s2323_s4] ss:$0 sm:$0xff] }
  0x8f   :  { %1332 = vmatmul.bf16.vlgmr.msrb.gmra.mxu1 %v124_v33  ;;  %1435 = vmatpush.bf16.msra.mxu0 %v2146_v53 }
  0x90   :  { %1345 = vmatmul.bf16.vlgmr.msrb.gmra.mxu2 %v125_v34 }
  0x91   :  { %1358 = vmatmul.bf16.vlgmr.msrb.gmra.mxu3 %v126_v35 }
  0x93   :  { %1436 = vmatpush.bf16.msra.mxu0 %v2145_v56 }
  0x97   :  { %1437 = vmatpush.bf16.msra.mxu0 %v2144_v57 }
  0x9b   :  { %1438 = vmatpush.bf16.msra.mxu0 %v2143_v60 }
  0x9f   :  { %1439 = vmatpush.bf16.msra.mxu0 %v2142_v61 }
  0xa3   :  { %1440 = vmatpush.bf16.msra.mxu0 %v2141_v63 }
  0xa7   :  { %1441 = vmatpush.bf16.msra.mxu0 %v2140_v2 }
  0xab   :  { %v1164_v37 = vpop.f32.mrf.mxu0  ;;  %1442 = vmatpush.bf16.msra.mxu0 %v2139_v8 }
  0xac   :  { %v1165_v38 = vadd.f32 %v2153_v36, %v1164_v37  ;;  %v1177_v39 = vpop.f32.mrf.mxu1 }
  0xae   :  { %v1178_v40 = vadd.f32 %v1177_v39, %v1165_v38 }
  0xb3   :  { %v1190_v41 = vpop.f32.mrf.mxu2  ;;  %v1166_v44 = vpop.f32.mrf.mxu0 }
  0xb4   :  { %v1191_v42 = vadd.f32 %v1190_v41, %v1178_v40  ;;  %v1203_v43 = vpop.f32.mrf.mxu3  ;;  %v1179_v46 = vpop.f32.mrf.mxu1 }
  0xb6   :  { %v1204_v45 = vadd.f32 %v1203_v43, %v1191_v42 }
  0xbb   :  { %v1192_v47 = vpop.f32.mrf.mxu2 }
  0xbc   :  { %v1205_v48 = vpop.f32.mrf.mxu3 }
  0xcb   :  { %v1216_v49 = vpop.f32.mrf.mxu0 }
  0xcc   :  { %v1229_v50 = vpop.f32.mrf.mxu1  ;;  %v1217_v1 = vadd.f32 %v1216_v49, %v1204_v45 }
  0xce   :  { %v1230_v6 = vadd.f32 %v1229_v50, %v1217_v1 }
  0xd3   :  { %v1242_v51 = vpop.f32.mrf.mxu2  ;;  %v1218_v54 = vpop.f32.mrf.mxu0 }
  0xd4   :  { %v1255_v52 = vpop.f32.mrf.mxu3  ;;  %v1231_v55 = vpop.f32.mrf.mxu1  ;;  %v1243_v9 = vadd.f32 %v1242_v51, %v1230_v6 }
  0xd6   :  { %v1256_v12 = vadd.f32 %v1255_v52, %v1243_v9 }
  0xdb   :  { %v1244_v58 = vpop.f32.mrf.mxu2 }
  0xdc   :  { %v1257_v59 = vpop.f32.mrf.mxu3 }
  0xeb   :  { %v1268_v62 = vpop.f32.mrf.mxu0 }
  0xec   :  { %v1281_v0 = vpop.f32.mrf.mxu1  ;;  %v1269_v13 = vadd.f32 %v1268_v62, %v1256_v12 }
  0xee   :  { %v1282_v14 = vadd.f32 %v1281_v0, %v1269_v13 }
  0xf3   :  { %v1294_v3 = vpop.f32.mrf.mxu2  ;;  %v1270_v5 = vpop.f32.mrf.mxu0 }
  0xf4   :  { %v1307_v4 = vpop.f32.mrf.mxu3  ;;  %v1283_v7 = vpop.f32.mrf.mxu1  ;;  %v1295_v15 = vadd.f32 %v1294_v3, %v1282_v14 }
  0xf6   :  { %v1308_v16 = vadd.f32 %v1307_v4, %v1295_v15 }
  0xfb   :  { %v1296_v10 = vpop.f32.mrf.mxu2 }
  0xfc   :  { %v1309_v11 = vpop.f32.mrf.mxu3 }
 0x10b   :  { %v1320_v17 = vpop.f32.mrf.mxu0 }
 0x10c   :  { %v1333_v18 = vpop.f32.mrf.mxu1  ;;  %v1321_v19 = vadd.f32 %v1320_v17, %v1308_v16 }
 0x10e   :  { %v1334_v20 = vadd.f32 %v1333_v18, %v1321_v19 }
 0x113   :  { %v1346_v21 = vpop.f32.mrf.mxu2  ;;  %v1322_v24 = vpop.f32.mrf.mxu0 }
 0x114   :  { %v1359_v22 = vpop.f32.mrf.mxu3  ;;  %v1347_v23 = vadd.f32 %v1346_v21, %v1334_v20  ;;  %v1335_v25 = vpop.f32.mrf.mxu1 }
 0x116   :  { %v1360_v26 = vadd.f32 %v1359_v22, %v1347_v23 }
 0x118   :  { %vm1363_vm0 = vcmp.gt.f32.partialorder %v1360_v26, 0.0  ;;  %v1364_v27 = vmul.f32 0.2, %v1360_v26 }
 0x11a   :  { %v1365_v28 = vsel %vm1363_vm0, %v1360_v26, %v1364_v27 }
 0x11b   :  { %v1366_v29 = vpack.c.bf16 %v1365_v28, %v1365_v28  ;;  %v1348_v30 = vpop.f32.mrf.mxu2 }
 0x11c   :  { %v1361_v31 = vpop.f32.mrf.mxu3 }
 0x11d   :  { %1443 = vmatmul.bf16.vlgmr.msra.gmra.mxu0 %v1366_v29 }
 0x19a   :  { %v1444_v33 = vpop.f32.mrf.mxu0 }
 0x19b   :  { %v1445_v34 = vadd.f32 %v2154_v32, %v1444_v33 }
 0x19d   :  { %1448 = vst [vmem:[#allocation8] sm:$0x3] %v1445_v34 }
 0x19e   :  { %1459 = dma.vmem_to_hbm [thread:$0]  %s1455_s11, 32, %s1457_s14, [#allocation4]  }
 0x1a2   :  { %v1446_v35 = vpop.f32.mrf.mxu0 }
 0x1a3   :  { %2255 = dma.done.wait [#allocation4], 32  }
 0x1a4   :  { %2256 = vsyncadd [#allocation4], 4294967264 }
 0x1a5   :  { %1464 = vsyncpa [#allocation3], 1 }
 0x1a6   :  { %1465 = vsyncpa [#allocation6], 1 }
 0x1a7   :  { %1466 = vsyncpa [#allocation4], 1 }

</bundles_post_ra>
